<compile_context>
chip_gen: v7x
topology: tpu7x:2x2x1
jax: 0.10.0
libtpu: 0.0.40
codegen_flags: <defaults>
</compile_context>

<pallas_src>
import math

import jax
import jax.numpy as jnp
from jax.experimental import pallas as pl
from jax.experimental.pallas import tpu as pltpu


_GELU_C = math.sqrt(2.0 / math.pi)


def _gelu_tanh(x):
    # tanh-approx gelu matching the reference; x*x*x avoids a generic pow path.
    return 0.5 * x * (1.0 + jnp.tanh(_GELU_C * (x + 0.044715 * (x * x * x))))


def _round_up(n, m):
    return (n + m - 1) // m * m


# ----------------------------------------------------------------------------
# Kernels. grid = (M_p/tm, ns_p/tk); axis 1 is the reduction over the hidden
# (n_state) dimension, so the output block index (i, 0) is constant across j
# and the output / accumulator tile stays resident in VMEM.
# ----------------------------------------------------------------------------
def _mlp_kernel_f32_out(x_ref, wfc_ref, bfc_ref, wproj_ref, bproj_ref, o_ref):
    """f32 output: accumulate straight into the resident output tile."""
    j = pl.program_id(1)

    @pl.when(j == 0)
    def _():
        # Fold b_proj into the init -> no epilogue RMW pass.
        o_ref[...] = jnp.broadcast_to(bproj_ref[...].astype(jnp.float32),
                                      o_ref.shape)

    # c_fc slab: (tm, nx_p) @ (nx_p, tk) -> (tm, tk), f32 accumulate on the MXU.
    h = jnp.dot(x_ref[...], wfc_ref[...], preferred_element_type=jnp.float32)
    h = _gelu_tanh(h + bfc_ref[...].astype(jnp.float32))

    # c_proj slab: (tm, tk) @ (tk, nx_p), accumulated into the output tile.
    # TODO(synk): optional bf16 operand cast here for f32 models trades a bit
    # of precision for ~3-4x MXU throughput on v6e/v7x.
    o_ref[...] += jnp.dot(h.astype(wproj_ref.dtype), wproj_ref[...],
                          preferred_element_type=jnp.float32)
    # dropout: nn.Dropout is identity in eval/inference mode.
    # TODO(synk): training-mode dropout (pltpu.prng_random_bits mask) not implemented.


def _mlp_kernel_acc(x_ref, wfc_ref, bfc_ref, wproj_ref, bproj_ref, o_ref, acc_ref):
    """Sub-f32 output: f32 VMEM accumulator, cast once in the epilogue."""
    j = pl.program_id(1)

    @pl.when(j == 0)
    def _():
        acc_ref[...] = jnp.broadcast_to(bproj_ref[...].astype(jnp.float32),
                                        acc_ref.shape)

    h = jnp.dot(x_ref[...], wfc_ref[...], preferred_element_type=jnp.float32)
    h = _gelu_tanh(h + bfc_ref[...].astype(jnp.float32))
    acc_ref[...] += jnp.dot(h.astype(wproj_ref.dtype), wproj_ref[...],
                            preferred_element_type=jnp.float32)

    @pl.when(j == pl.num_programs(1) - 1)
    def _():
        o_ref[...] = acc_ref[...].astype(o_ref.dtype)


# ----------------------------------------------------------------------------
# Generation-aware configuration.
# ----------------------------------------------------------------------------
def _device_config():
    """Returns (vmem_limit_bytes, tensorcores_per_chip) for the attached TPU."""
    vmem_phys = None
    try:
        vmem_phys = pltpu.get_tpu_info().vmem_capacity_bytes
    except Exception:
        pass
    kind = ""
    try:
        kind = jax.devices()[0].device_kind.lower()
    except Exception:
        pass
    is_v7 = "7" in kind  # "tpu7x" etc.; v2-v6 device_kind strings contain no '7'
    if vmem_phys is None:
        vmem_phys = (64 if is_v7 else 128) * 1024 * 1024
    # Leave headroom for compiler-internal scratch; cap at ~100 MiB on 128 MiB
    # parts and ~56 MiB on 64 MiB (v7x) parts.
    vmem_limit = min(vmem_phys - 8 * 1024 * 1024, 100 * 1024 * 1024)
    return vmem_limit, (2 if is_v7 else 1)


def _vmem_plan_bytes(tm, tk, nx_p, in_isz, w_isz, out_isz, need_acc):
    """Double-buffer-aware VMEM footprint of one pipeline stage pair."""
    b = 2 * tm * nx_p * in_isz          # x row tile
    b += 2 * nx_p * tk * w_isz          # W_fc column slab
    b += 2 * 8 * tk * w_isz             # b_fc slice (sublane padded)
    b += 2 * tk * nx_p * w_isz          # W_proj row slab
    b += 2 * 8 * nx_p * w_isz           # b_proj
    b += 2 * tm * nx_p * out_isz        # output tile
    if need_acc:
        b += tm * nx_p * 4              # f32 accumulator scratch (single buffer)
    return b


def _choose_tiles(M, nx_p, n_state, in_isz, w_isz, out_isz, need_acc,
                  vmem_limit, num_cores, tm, tk):
    sub = max(8, 32 // in_isz)          # f32 -> 8, bf16 -> 16, int8/fp8 -> 32
    budget = int(vmem_limit * 0.85)

    if tm is None or tk is None:
        tm_cap = 1024 if in_isz < 4 else 512
        tm_pick, tk_pick = 128, 128
        for tm_c in (1024, 512, 256, 128):
            if tm_c > tm_cap:
                continue
            found = False
            for tk_c in (1024, 512, 256, 128):
                if _vmem_plan_bytes(tm_c, tk_c, nx_p, in_isz, w_isz, out_isz,
                                    need_acc) <= budget:
                    tm_pick, tk_pick = tm_c, tk_c
                    found = True
                    break
            if found:
                break
        tm = tm_pick if tm is None else tm
        tk = tk_pick if tk is None else tk

    tm_eff = min(tm, _round_up(M, sub))
    tk_eff = min(tk, _round_up(n_state, 128))

    # v7x: 2 TensorCores share the "parallel" grid axis -> keep >= 2 row tiles.
    if num_cores >= 2 and _round_up(M, sub) <= tm_eff and M > sub:
        tm_eff = max(sub, _round_up(-(-M // 2), sub))

    return tm_eff, tk_eff


# ----------------------------------------------------------------------------
# Wrapper.
# ----------------------------------------------------------------------------
def mlp_pallas(x, w_fc, b_fc, w_proj, b_proj, *, tm=None, tk=None):
    """GPT-2 MLP forward: dropout(gelu(x @ W_fc + b_fc) @ W_proj + b_proj).

    x: (B, T, nx);  w_fc: (nx, n_state);  w_proj: (n_state, nx).
    Dropout is identity (eval mode).
    """
    B, T, nx = x.shape
    nx_w, n_state = w_fc.shape
    assert nx_w == nx and w_proj.shape == (n_state, nx)
    assert b_fc.shape == (n_state,) and b_proj.shape == (nx,)
    M = B * T

    in_isz = jnp.dtype(x.dtype).itemsize
    w_isz = jnp.dtype(w_fc.dtype).itemsize
    out_isz = in_isz
    need_acc = jnp.dtype(x.dtype) != jnp.dtype(jnp.float32)

    vmem_limit, num_cores = _device_config()
    nx_p = _round_up(nx, 128)                       # lane-dense x / out tiles
    tm_eff, tk_eff = _choose_tiles(M, nx_p, n_state, in_isz, w_isz, out_isz,
                                   need_acc, vmem_limit, num_cores, tm, tk)
    M_p = _round_up(M, tm_eff)
    ns_p = _round_up(n_state, tk_eff)

    def pad2(a, r, c):
        pr, pc = r - a.shape[0], c - a.shape[1]
        return jnp.pad(a, ((0, pr), (0, pc))) if (pr or pc) else a

    x2d = pad2(x.reshape(M, nx), M_p, nx_p)
    wfc = pad2(w_fc, nx_p, ns_p)
    bfc = pad2(b_fc.reshape(1, n_state), 1, ns_p)
    wproj = pad2(w_proj, ns_p, nx_p)
    bproj = pad2(b_proj.reshape(1, nx), 1, nx_p)

    grid = (M_p // tm_eff, ns_p // tk_eff)
    n_row_tiles = grid[0]

    # Weights are re-streamed once per row tile; bias/activation traffic once.
    cost = pl.CostEstimate(
        flops=4 * M * nx * n_state,                     # two matmuls
        transcendentals=M * n_state,                    # tanh in gelu
        bytes_accessed=(in_isz * M_p * nx_p             # x read
                        + out_isz * M_p * nx_p          # out write
                        + n_row_tiles * w_isz
                          * (2 * nx_p * ns_p + ns_p + nx_p)),  # W_fc/W_proj/biases
    )

    kernel = _mlp_kernel_acc if need_acc else _mlp_kernel_f32_out
    scratch = [pltpu.VMEM((tm_eff, nx_p), jnp.float32)] if need_acc else []

    out2d = pl.pallas_call(
        kernel,
        out_shape=jax.ShapeDtypeStruct((M_p, nx_p), x.dtype),
        grid_spec=pltpu.PrefetchScalarGridSpec(
            num_scalar_prefetch=0,
            grid=grid,
            in_specs=[
                pl.BlockSpec((tm_eff, nx_p), lambda i, j: (i, 0)),   # x rows
                pl.BlockSpec((nx_p, tk_eff), lambda i, j: (0, j)),   # W_fc slab
                pl.BlockSpec((1, tk_eff),    lambda i, j: (0, j)),   # b_fc slice
                pl.BlockSpec((tk_eff, nx_p), lambda i, j: (j, 0)),   # W_proj slab
                pl.BlockSpec((1, nx_p),      lambda i, j: (0, 0)),   # b_proj
            ],
            out_specs=pl.BlockSpec((tm_eff, nx_p), lambda i, j: (i, 0)),
            scratch_shapes=scratch,
        ),
        compiler_params=pltpu.CompilerParams(
            dimension_semantics=("parallel", "arbitrary"),
            vmem_limit_bytes=int(vmem_limit),
        ),
        cost_estimate=cost,
    )(x2d, wfc, bfc, wproj, bproj)

    return out2d[:M, :nx].reshape(B, T, nx)


def mlp_reference(x, w_fc, b_fc, w_proj, b_proj):
    h = _gelu_tanh(jnp.einsum("btc,cf->btf", x.astype(jnp.float32),
                              w_fc.astype(jnp.float32)) + b_fc.astype(jnp.float32))
    h2 = jnp.einsum("btf,fc->btc", h, w_proj.astype(jnp.float32)) + b_proj.astype(jnp.float32)
    return h2.astype(x.dtype)


if __name__ == "__main__":
    key = jax.random.PRNGKey(0)
    cases = [
        # (B, T, nx, n_state, dtype, atol)
        (2, 8, 32, 128, jnp.float32, 1e-5),    # lane padding (nx < 128)
        (2, 5, 48, 160, jnp.float32, 1e-5),    # ragged rows + non-128 n_state
        (2, 8, 64, 256, jnp.bfloat16, 3e-2),   # bf16 path (f32 scratch accumulator)
    ]
    for (B, T, nx, n_state, dtype, atol) in cases:
        key, kx, kwf, kbf, kwp, kbp = jax.random.split(key, 6)
        x = jax.random.normal(kx, (B, T, nx), dtype=jnp.float32).astype(dtype)
        # Conv1D init: weight ~ N(0, 0.02); bias perturbed for a non-trivial test.
        w_fc = (0.02 * jax.random.normal(kwf, (nx, n_state))).astype(dtype)
        b_fc = (0.01 * jax.random.normal(kbf, (n_state,))).astype(dtype)
        w_proj = (0.02 * jax.random.normal(kwp, (n_state, nx))).astype(dtype)
        b_proj = (0.01 * jax.random.normal(kbp, (nx,))).astype(dtype)

        out = jax.block_until_ready(mlp_pallas(x, w_fc, b_fc, w_proj, b_proj))
        ref = mlp_reference(x, w_fc, b_fc, w_proj, b_proj)
        assert out.shape == (B, T, nx)
        assert jnp.allclose(out.astype(jnp.float32), ref.astype(jnp.float32),
                            atol=atol, rtol=atol), \
            f"mismatch vs reference for shape {(B, T, nx, n_state, dtype)}"

    print("KERNEL_OK")
</pallas_src>

<mosaic_0001>
module attributes {stable_mosaic.version = 11 : i64} {
  func.func @_mlp_kernel_f32_out(%arg0: i32, %arg1: i32, %arg2: memref<16x128xf32, #tpu.memory_space<vmem>>, %arg3: memref<128x128xf32, #tpu.memory_space<vmem>>, %arg4: memref<1x128xf32, #tpu.memory_space<vmem>>, %arg5: memref<128x128xf32, #tpu.memory_space<vmem>>, %arg6: memref<1x128xf32, #tpu.memory_space<vmem>>, %arg7: memref<16x128xf32, #tpu.memory_space<vmem>>) attributes {dimension_semantics = [#tpu.dimension_semantics<parallel>, #tpu.dimension_semantics<arbitrary>], iteration_bounds = array<i64: 1, 1>, scalar_prefetch = 0 : i64, scratch_operands = 0 : i64, tpu.core_type = #tpu.core_type<tc>, window_params = [{transform_indices = @transform_0, window_bounds = array<i64: 16, 128>}, {transform_indices = @transform_1, window_bounds = array<i64: 128, 128>}, {transform_indices = @transform_2, window_bounds = array<i64: 1, 128>}, {transform_indices = @transform_3, window_bounds = array<i64: 128, 128>}, {pipeline_mode = #tpu.pipeline_mode<synchronous>, transform_indices = @transform_4, window_bounds = array<i64: 1, 128>}, {transform_indices = @transform_5, window_bounds = array<i64: 16, 128>}]} {
    %c0_i32 = arith.constant 0 : i32
    %0 = arith.cmpi eq, %arg1, %c0_i32 : i32
    %1 = arith.extui %0 : i1 to i32
    %c0_i32_0 = arith.constant 0 : i32
    %2 = arith.cmpi ne, %1, %c0_i32_0 : i32
    scf.if %2 {
      %c0_17 = arith.constant 0 : index
      %c0_18 = arith.constant 0 : index
      %27 = vector.load %arg6[%c0_17, %c0_18] : memref<1x128xf32, #tpu.memory_space<vmem>>, vector<1x128xf32>
      %28 = vector.shape_cast %27 : vector<1x128xf32> to vector<1x128xf32>
      %29 = vector.broadcast %28 : vector<1x128xf32> to vector<16x128xf32>
      %c0_19 = arith.constant 0 : index
      %c0_20 = arith.constant 0 : index
      %30 = vector.load %arg7[%c0_19, %c0_20] : memref<16x128xf32, #tpu.memory_space<vmem>>, vector<16x128xf32>
      tpu.vector_store %arg7[%c0_19, %c0_20], %29 {strides = array<i32>} : memref<16x128xf32, #tpu.memory_space<vmem>>, vector<16x128xf32>,
    } else {
    }
    %c0 = arith.constant 0 : index
    %c0_1 = arith.constant 0 : index
    %3 = vector.load %arg2[%c0, %c0_1] : memref<16x128xf32, #tpu.memory_space<vmem>>, vector<16x128xf32>
    %c0_2 = arith.constant 0 : index
    %c0_3 = arith.constant 0 : index
    %4 = vector.load %arg3[%c0_2, %c0_3] : memref<128x128xf32, #tpu.memory_space<vmem>>, vector<128x128xf32>
    %cst = arith.constant dense<0.000000e+00> : vector<16x128xf32>
    %5 = tpu.matmul %3, %4, %cst {dimension_numbers = #tpu.dot_dimension_numbers<[1], [0], [0], [1], [0, 0, 1, 1], [], []>} : vector<16x128xf32>, vector<128x128xf32>, vector<16x128xf32> -> vector<16x128xf32>
    %c0_4 = arith.constant 0 : index
    %c0_5 = arith.constant 0 : index
    %6 = vector.load %arg4[%c0_4, %c0_5] : memref<1x128xf32, #tpu.memory_space<vmem>>, vector<1x128xf32>
    %7 = vector.broadcast %6 : vector<1x128xf32> to vector<16x128xf32>
    %8 = arith.addf %5, %7 : vector<16x128xf32>
    %cst_6 = arith.constant 5.000000e-01 : f32
    %9 = vector.broadcast %cst_6 : f32 to vector<16x128xf32>
    %10 = arith.mulf %9, %8 : vector<16x128xf32>
    %11 = arith.mulf %8, %8 : vector<16x128xf32>
    %12 = arith.mulf %11, %8 : vector<16x128xf32>
    %cst_7 = arith.constant 4.471500e-02 : f32
    %13 = vector.broadcast %cst_7 : f32 to vector<16x128xf32>
    %14 = arith.mulf %13, %12 : vector<16x128xf32>
    %15 = arith.addf %8, %14 : vector<16x128xf32>
    %cst_8 = arith.constant 0.797884583 : f32
    %16 = vector.broadcast %cst_8 : f32 to vector<16x128xf32>
    %17 = arith.mulf %16, %15 : vector<16x128xf32>
    %18 = math.tanh %17 : vector<16x128xf32>
    %cst_9 = arith.constant 1.000000e+00 : f32
    %19 = vector.broadcast %cst_9 : f32 to vector<16x128xf32>
    %20 = arith.addf %19, %18 : vector<16x128xf32>
    %21 = arith.mulf %10, %20 : vector<16x128xf32>
    %c0_10 = arith.constant 0 : index
    %c0_11 = arith.constant 0 : index
    %22 = vector.load %arg7[%c0_10, %c0_11] : memref<16x128xf32, #tpu.memory_space<vmem>>, vector<16x128xf32>
    %c0_12 = arith.constant 0 : index
    %c0_13 = arith.constant 0 : index
    %23 = vector.load %arg5[%c0_12, %c0_13] : memref<128x128xf32, #tpu.memory_space<vmem>>, vector<128x128xf32>
    %cst_14 = arith.constant dense<0.000000e+00> : vector<16x128xf32>
    %24 = tpu.matmul %21, %23, %cst_14 {dimension_numbers = #tpu.dot_dimension_numbers<[1], [0], [0], [1], [0, 0, 1, 1], [], []>} : vector<16x128xf32>, vector<128x128xf32>, vector<16x128xf32> -> vector<16x128xf32>
    %25 = arith.addf %22, %24 : vector<16x128xf32>
    %c0_15 = arith.constant 0 : index
    %c0_16 = arith.constant 0 : index
    %26 = vector.load %arg7[%c0_15, %c0_16] : memref<16x128xf32, #tpu.memory_space<vmem>>, vector<16x128xf32>
    tpu.vector_store %arg7[%c0_15, %c0_16], %25 {strides = array<i32>} : memref<16x128xf32, #tpu.memory_space<vmem>>, vector<16x128xf32>,
    return
  }
  func.func @transform_0(%arg0: i32, %arg1: i32) -> (i32, i32) {
    %c0_i32 = arith.constant 0 : i32
    %c0_i32_0 = arith.constant 0 : i32
    return %arg0, %c0_i32 : i32, i32
  }
  func.func @transform_1(%arg0: i32, %arg1: i32) -> (i32, i32) {
    %c0_i32 = arith.constant 0 : i32
    %c0_i32_0 = arith.constant 0 : i32
    return %c0_i32, %arg1 : i32, i32
  }
  func.func @transform_2(%arg0: i32, %arg1: i32) -> (i32, i32) {
    %c0_i32 = arith.constant 0 : i32
    %c0_i32_0 = arith.constant 0 : i32
    return %c0_i32, %arg1 : i32, i32
  }
  func.func @transform_3(%arg0: i32, %arg1: i32) -> (i32, i32) {
    %c0_i32 = arith.constant 0 : i32
    %c0_i32_0 = arith.constant 0 : i32
    return %arg1, %c0_i32 : i32, i32
  }
  func.func @transform_4(%arg0: i32, %arg1: i32) -> (i32, i32) {
    %c0_i32 = arith.constant 0 : i32
    %c0_i32_0 = arith.constant 0 : i32
    %c0_i32_1 = arith.constant 0 : i32
    return %c0_i32, %c0_i32_0 : i32, i32
  }
  func.func @transform_5(%arg0: i32, %arg1: i32) -> (i32, i32) {
    %c0_i32 = arith.constant 0 : i32
    %c0_i32_0 = arith.constant 0 : i32
    return %arg0, %c0_i32 : i32, i32
  }
}

</mosaic_0001>

<bundles_post_ra>
// kernel: tpu_custom_call.1
= control target key start
LH: loop header
LB: loop body
LE: loop exit
PB: predicated region body
PF: predicated region fallthrough
CT: control target
= control target key end

     0   :  { %10 = vsyncpa [#allocation3], 0  ;;  %s785_s0 = inlined_call_operand.hbm [shape: f32[16,128], index: 0, kind: input, shape index: {}]   ;;  %s786_s1 = inlined_call_operand.hbm [shape: f32[128,128], index: 1, kind: input, shape index: {}]   ;;  %s787_s2 = inlined_call_operand.hbm [shape: f32[1,128], index: 2, kind: input, shape index: {}]   ;;  %s788_s3 = inlined_call_operand.hbm [shape: f32[128,128], index: 3, kind: input, shape index: {}]   ;;  %s789_s4 = inlined_call_operand.hbm [shape: f32[1,128], index: 4, kind: input, shape index: {}]   ;;  %s790_s5 = inlined_call_operand.hbm [shape: f32[16,128], index: 5, kind: output, shape index: {}]  }
   0x1   :  { %11 = vsyncpa [#allocation6], 0 }
   0x2   :  { %12 = vsyncpa [#allocation9], 0 }
   0x3   :  { %13 = vsyncpa [#allocation4], 0  ;;  %s656_s18 = smov [#allocation5]   ;;  %s657_s20 = smov [#allocation8]  }
   0x4   :  { %s31_s19 = sshll.u32 %s656_s18, 4  ;;  %s53_s21 = sshll.u32 %s657_s20, 4  ;;  %s32_s19 = int_to_ptr.vmem [resolvable:$true] %s31_s19  ;;  %s694_s21 = int_to_ptr.vmem [resolvable:$true] %s53_s21 }
   0x5   :  { %s516_s24 = scalar_lea.hbm %s786_s1, 2048 }
   0x6   :  { %p517_p0 = scmp.ne.s32.totalorder %s786_s1, %s516_s24  ;;  %p520_p1 = scmp.lt.u32.totalorder %s516_s24, %s786_s1 }
   0x8   :  { %p522_p2 = pnand %p520_p1, %p517_p0 }
   0xa   :  { %525 = shalt.err (!%p522_p2)
}
   0xb   :  { %s526_s29 = scalar_lea.vmem %s32_s19, 2048  ;;  %p531_p4 = scmp.lt.s32.totalorder %s32_s19, %s32_s19 }
   0xc   :  { %p527_p3 = scmp.ne.s32.totalorder %s32_s19, %s526_s29  ;;  %p532_p5 = scmp.lt.s32.totalorder %s526_s29, %s526_s29 }
   0xe   :  { %p533_p6 = por %p532_p5, %p531_p4 }
  0x10   :  { %p534_p7 = pnand %p533_p6, %p527_p3 }
  0x12   :  { %537 = shalt.err (!%p534_p7)
}
  0x13   :  { %s658_s30 = smov 128   ;;  %s659_s6 = smov 8  }
  0x14   :  { %37 = dma.hbm_to_vmem [thread:$0]  %s786_s1, 2048, %s32_s19, [#allocation6], %s658_s30, %s658_s30, %s659_s6  }
  0x15   :  { %s538_s11 = scalar_lea.hbm %s788_s3, 2048 }
  0x16   :  { %p539_p8 = scmp.ne.s32.totalorder %s788_s3, %s538_s11  ;;  %p542_p9 = scmp.lt.u32.totalorder %s538_s11, %s788_s3 }
  0x18   :  { %p544_p10 = pnand %p542_p9, %p539_p8 }
  0x1a   :  { %547 = shalt.err (!%p544_p10)
}
  0x1b   :  { %s548_s16 = scalar_lea.vmem %s694_s21, 2048  ;;  %p553_p12 = scmp.lt.s32.totalorder %s694_s21, %s694_s21 }
  0x1c   :  { %p549_p11 = scmp.ne.s32.totalorder %s694_s21, %s548_s16  ;;  %p554_p13 = scmp.lt.s32.totalorder %s548_s16, %s548_s16 }
  0x1e   :  { %p555_p0 = por %p554_p13, %p553_p12 }
  0x20   :  { %p556_p1 = pnand %p555_p0, %p549_p11 }
  0x22   :  { %559 = shalt.err (!%p556_p1)
}
  0x23   :  { %59 = dma.hbm_to_vmem [thread:$0]  %s788_s3, 2048, %s694_s21, [#allocation9], %s658_s30, %s658_s30, %s659_s6  }
  0x24   :  { %s660_s18 = smov [#allocation2]   ;;  %s661_s20 = smov [#allocation7]  }
  0x25   :  { %s19_s19 = sshll.u32 %s660_s18, 4  ;;  %s44_s22 = sshll.u32 %s661_s20, 4  ;;  %s20_s19 = int_to_ptr.vmem [resolvable:$true] %s19_s19  ;;  %s45_s22 = int_to_ptr.vmem [resolvable:$true] %s44_s22 }
  0x26   :  { %s560_s25 = scalar_lea.hbm %s785_s0, 256 }
  0x27   :  { %p561_p2 = scmp.ne.s32.totalorder %s785_s0, %s560_s25  ;;  %p564_p3 = scmp.lt.u32.totalorder %s560_s25, %s785_s0 }
  0x29   :  { %p566_p4 = pnand %p564_p3, %p561_p2 }
  0x2b   :  { %569 = shalt.err (!%p566_p4)
}
  0x2c   :  { %s570_s3 = scalar_lea.vmem %s20_s19, 256  ;;  %p575_p6 = scmp.lt.s32.totalorder %s20_s19, %s20_s19 }
  0x2d   :  { %p571_p5 = scmp.ne.s32.totalorder %s20_s19, %s570_s3  ;;  %p576_p7 = scmp.lt.s32.totalorder %s570_s3, %s570_s3 }
  0x2f   :  { %p577_p8 = por %p576_p7, %p575_p6 }
  0x31   :  { %p578_p9 = pnand %p577_p8, %p571_p5 }
  0x33   :  { %581 = shalt.err (!%p578_p9)
}
  0x34   :  { %25 = dma.hbm_to_vmem [thread:$0]  %s785_s0, 256, %s20_s19, [#allocation3], %s658_s30, %s658_s30, %s659_s6  }
  0x35   :  { %s582_s10 = scalar_lea.hbm %s787_s2, 16 }
  0x36   :  { %p583_p10 = scmp.ne.s32.totalorder %s787_s2, %s582_s10  ;;  %p586_p11 = scmp.lt.u32.totalorder %s582_s10, %s787_s2 }
  0x38   :  { %p588_p12 = pnand %p586_p11, %p583_p10 }
  0x3a   :  { %591 = shalt.err (!%p588_p12)
}
  0x3b   :  { %s592_s15 = scalar_lea.vmem %s45_s22, 16  ;;  %s596_s16 = scalar_lea.vmem %s45_s22, 32 }
  0x3c   :  { %p593_p13 = scmp.ne.s32.totalorder %s45_s22, %s592_s15  ;;  %p597_p0 = scmp.lt.s32.totalorder %s45_s22, %s45_s22 }
  0x3d   :  { %p598_p1 = scmp.lt.s32.totalorder %s596_s16, %s592_s15 }
  0x3f   :  { %p599_p2 = por %p598_p1, %p597_p0 }
  0x41   :  { %p600_p3 = pnand %p599_p2, %p593_p13 }
  0x43   :  { %603 = shalt.err (!%p600_p3)
}
  0x44   :  { %47 = dma.hbm_to_vmem [thread:$0]  %s787_s2, 16, %s45_s22, [#allocation6]  }
  0x45   :  { %s662_s17 = smov [#allocation10]   ;;  %s604_s23 = scalar_lea.hbm %s789_s4, 16 }
  0x46   :  { %s66_s18 = sshll.u32 %s662_s17, 4  ;;  %p605_p4 = scmp.ne.s32.totalorder %s789_s4, %s604_s23  ;;  %s67_s18 = int_to_ptr.vmem [resolvable:$true] %s66_s18 }
  0x47   :  { %p608_p5 = scmp.lt.u32.totalorder %s604_s23, %s789_s4 }
  0x49   :  { %p610_p6 = pnand %p608_p5, %p605_p4 }
  0x4b   :  { %613 = shalt.err (!%p610_p6)
}
  0x4c   :  { %s614_s28 = scalar_lea.vmem %s67_s18, 16  ;;  %s618_s2 = scalar_lea.vmem %s67_s18, 32 }
  0x4d   :  { %p615_p7 = scmp.ne.s32.totalorder %s67_s18, %s614_s28  ;;  %p619_p8 = scmp.lt.s32.totalorder %s67_s18, %s67_s18 }
  0x4e   :  { %p620_p9 = scmp.lt.s32.totalorder %s618_s2, %s614_s28 }
  0x50   :  { %p621_p10 = por %p620_p9, %p619_p8 }
  0x52   :  { %p622_p11 = pnand %p621_p10, %p615_p7 }
  0x54   :  { %625 = shalt.err (!%p622_p11)
}
  0x55   :  { %69 = dma.hbm_to_vmem [thread:$0]  %s789_s4, 16, %s67_s18, [#allocation9]  }
  0x56   :  { %648 = dma.done.wait [#allocation3], 256  }
  0x57   :  { %649 = vsyncadd [#allocation3], 4294967040 }
  0x58   :  { %650 = dma.done.wait [#allocation6], 2064  }
  0x59   :  { %651 = vsyncadd [#allocation6], 4294965232 }
  0x5a   :  { %652 = dma.done.wait [#allocation9], 2064  }
  0x5b   :  { %653 = vsyncadd [#allocation9], 4294965232  ;;  %v100_v0 = vld [vmem:[#allocation5] sm:$0xff]  ;;  %v101_v1 = vld [vmem:[#allocation5 + $0x8] sm:$0xff]  ;;  %s663_s4 = smov [#allocation11]  }
  0x5c   :  { %v102_v2 = vld [vmem:[#allocation5 + $0x10] sm:$0xff]  ;;  %v440_v3 = vpack.c.bf16 %v101_v1, %v100_v0  ;;  %v103_v4 = vld [vmem:[#allocation5 + $0x18] sm:$0xff]  ;;  %v104_v6 = vld [vmem:[#allocation5 + $0x20] sm:$0xff]  ;;  %s318_s3 = sshll.u32 %s663_s4, 4  ;;  %s319_s3 = int_to_ptr.vmem [resolvable:$true] %s318_s3 }
  0x5d   :  { %v444_v5 = vpack.c.bf16 %v103_v4, %v102_v2  ;;  %v105_v7 = vld [vmem:[#allocation5 + $0x28] sm:$0xff]  ;;  %v106_v9 = vld [vmem:[#allocation5 + $0x30] sm:$0xff]  ;;  %v107_v11 = vld [vmem:[#allocation5 + $0x38] sm:$0xff]  ;;  %s626_s21 = scalar_lea.vmem %s319_s3, 256  ;;  %p631_p13 = scmp.lt.s32.totalorder %s319_s3, %s319_s3 }
  0x5e   :  { %441 = vmatprep.subr.bf16.mxu0 %v440_v3  ;;  %v448_v8 = vpack.c.bf16 %v105_v7, %v104_v6  ;;  %v98_v10 = vld [vmem:[#allocation2] sm:$0xff]  ;;  %v218_v12 = vld [vmem:[#allocation8] sm:$0xff]  ;;  %v452_v15 = vpack.c.bf16 %v107_v11, %v106_v9  ;;  %v111_v20 = vld [vmem:[#allocation5 + $0x58] sm:$0xff]  ;;  %p627_p12 = scmp.ne.s32.totalorder %s319_s3, %s626_s21  ;;  %p632_p0 = scmp.lt.s32.totalorder %s626_s21, %s626_s21 }
  0x5f   :  { %443 = vmatpush3.bf16.msra.mxu0 %v440_v3  ;;  %402 = vmatprep.mubr.f32.mxu0 %v98_v10  ;;  %v219_v13 = vld [vmem:[#allocation8 + $0x8] sm:$0xff]  ;;  %v108_v16 = vld [vmem:[#allocation5 + $0x40] sm:$0xff]  ;;  %v115_v26 = vld [vmem:[#allocation5 + $0x78] sm:$0xff] }
  0x60   :  { %445 = vmatprep.subr.bf16.mxu0 %v444_v5  ;;  %v472_v14 = vpack.c.bf16 %v219_v13, %v218_v12  ;;  %v109_v17 = vld [vmem:[#allocation5 + $0x48] sm:$0xff]  ;;  %v110_v19 = vld [vmem:[#allocation5 + $0x50] sm:$0xff]  ;;  %v112_v22 = vld [vmem:[#allocation5 + $0x60] sm:$0xff]  ;;  %p633_p1 = por %p632_p0, %p631_p13 }
  0x61   :  { %v456_v18 = vpack.c.bf16 %v109_v17, %v108_v16  ;;  %v460_v21 = vpack.c.bf16 %v111_v20, %v110_v19  ;;  %v113_v23 = vld [vmem:[#allocation5 + $0x68] sm:$0xff]  ;;  %v114_v25 = vld [vmem:[#allocation5 + $0x70] sm:$0xff]  ;;  %v99_v28 = vld [vmem:[#allocation2 + $0x8] sm:$0xff] }
  0x62   :  { %473 = vmatprep.subr.bf16.mxu1 %v472_v14  ;;  %v464_v24 = vpack.c.bf16 %v113_v23, %v112_v22  ;;  %v468_v27 = vpack.c.bf16 %v115_v26, %v114_v25  ;;  %v220_v29 = vld [vmem:[#allocation8 + $0x10] sm:$0xff]  ;;  %v221_v30 = vld [vmem:[#allocation8 + $0x18] sm:$0xff]  ;;  %v222_v32 = vld [vmem:[#allocation8 + $0x20] sm:$0xff]  ;;  %p634_p2 = pnand %p633_p1, %p627_p12 }
  0x63   :  { %447 = vmatpush3.bf16.msra.mxu0 %v444_v5  ;;  %475 = vmatpush3.bf16.msra.mxu1 %v472_v14  ;;  %v476_v31 = vpack.c.bf16 %v221_v30, %v220_v29  ;;  %v223_v33 = vld [vmem:[#allocation8 + $0x28] sm:$0xff]  ;;  %v224_v35 = vld [vmem:[#allocation8 + $0x30] sm:$0xff]  ;;  %v225_v36 = vld [vmem:[#allocation8 + $0x38] sm:$0xff] }
  0x64   :  { %449 = vmatprep.subr.bf16.mxu0 %v448_v8  ;;  %v480_v34 = vpack.c.bf16 %v223_v33, %v222_v32  ;;  %v484_v37 = vpack.c.bf16 %v225_v36, %v224_v35  ;;  %v226_v38 = vld [vmem:[#allocation8 + $0x40] sm:$0xff]  ;;  %v227_v39 = vld [vmem:[#allocation8 + $0x48] sm:$0xff]  ;;  %v228_v40 = vld [vmem:[#allocation8 + $0x50] sm:$0xff] }
  0x65   :  { %477 = vmatprep.subr.bf16.mxu1 %v476_v31  ;;  %v488_v41 = vpack.c.bf16 %v227_v39, %v226_v38  ;;  %v229_v42 = vld [vmem:[#allocation8 + $0x58] sm:$0xff]  ;;  %v230_v44 = vld [vmem:[#allocation8 + $0x60] sm:$0xff]  ;;  %v231_v45 = vld [vmem:[#allocation8 + $0x68] sm:$0xff] }
  0x66   :  { %v492_v43 = vpack.c.bf16 %v229_v42, %v228_v40  ;;  %v496_v46 = vpack.c.bf16 %v231_v45, %v230_v44  ;;  %v232_v47 = vld [vmem:[#allocation8 + $0x70] sm:$0xff]  ;;  %v233_v48 = vld [vmem:[#allocation8 + $0x78] sm:$0xff]  ;;  %v332_v9 = vld [vmem:[#allocation10] ss:$0 sm:$0xff] }
  0x67   :  { %451 = vmatpush3.bf16.msra.mxu0 %v448_v8  ;;  %479 = vmatpush3.bf16.msra.mxu1 %v476_v31  ;;  %v500_v49 = vpack.c.bf16 %v233_v48, %v232_v47  ;;  %v333_v50 = vld [vmem:[#allocation7] ss:$0 sm:$0xff] }
  0x68   :  { %453 = vmatprep.subr.bf16.mxu0 %v452_v15  ;;  %481 = vmatprep.subr.bf16.mxu1 %v480_v34 }
  0x6b   :  { %455 = vmatpush3.bf16.msra.mxu0 %v452_v15  ;;  %483 = vmatpush3.bf16.msra.mxu1 %v480_v34 }
  0x6c   :  { %457 = vmatprep.subr.bf16.mxu0 %v456_v18  ;;  %485 = vmatprep.subr.bf16.mxu1 %v484_v37 }
  0x6f   :  { %459 = vmatpush3.bf16.msra.mxu0 %v456_v18  ;;  %487 = vmatpush3.bf16.msra.mxu1 %v484_v37 }
  0x70   :  { %461 = vmatprep.subr.bf16.mxu0 %v460_v21  ;;  %489 = vmatprep.subr.bf16.mxu1 %v488_v41 }
  0x73   :  { %463 = vmatpush3.bf16.msra.mxu0 %v460_v21  ;;  %491 = vmatpush3.bf16.msra.mxu1 %v488_v41 }
  0x74   :  { %465 = vmatprep.subr.bf16.mxu0 %v464_v24  ;;  %493 = vmatprep.subr.bf16.mxu1 %v492_v43 }
  0x77   :  { %467 = vmatpush3.bf16.msra.mxu0 %v464_v24  ;;  %495 = vmatpush3.bf16.msra.mxu1 %v492_v43 }
  0x78   :  { %469 = vmatprep.subr.bf16.mxu0 %v468_v27  ;;  %497 = vmatprep.subr.bf16.mxu1 %v496_v46 }
  0x7b   :  { %471 = vmatpush3.bf16.msra.mxu0 %v468_v27  ;;  %499 = vmatpush3.bf16.msra.mxu1 %v496_v46 }
  0x7c   :  { %501 = vmatprep.subr.bf16.mxu1 %v500_v49 }
  0x7e   :  { %403 = vmatmul.mubr.f32.vlgmr.msra.gmra.mrb[0].mxu0 %v99_v28 }
  0x7f   :  { %503 = vmatpush3.bf16.msra.mxu1 %v500_v49 }
 0x151   :  { %v404_v51 = vpop.f32.mrb[0].mxu0 }
 0x152   :  { %v195_v52 = vadd.f32 %v404_v51, %v333_v50  ;;  %v189_v53 = vpop.f32.mrb[1].mxu0 }
 0x153   :  { %v190_v54 = vadd.f32 %v333_v50, %v189_v53 }
 0x154   :  { %v201_v55 = vmul.f32 %v195_v52, %v195_v52  ;;  %v199_v6 = vmul.f32 0.5, %v195_v52 }
 0x155   :  { %v200_v56 = vmul.f32 %v190_v54, %v190_v54  ;;  %v198_v4 = vmul.f32 0.5, %v190_v54 }
 0x156   :  { %v203_v57 = vmul.f32 %v201_v55, %v195_v52 }
 0x157   :  { %v202_v58 = vmul.f32 %v200_v56, %v190_v54 }
 0x158   :  { %v205_v59 = vmul.f32 0.044715, %v203_v57 }
 0x159   :  { %v204_v60 = vmul.f32 0.044715, %v202_v58 }
 0x15a   :  { %v207_v61 = vadd.f32 %v205_v59, %v195_v52 }
 0x15b   :  { %v206_v62 = vadd.f32 %v204_v60, %v190_v54 }
 0x15c   :  { %v209_v63 = vmul.f32 0.7978846, %v207_v61 }
 0x15d   :  { %v208_v0 = vmul.f32 0.7978846, %v206_v62 }
 0x15e   :  { %512 = vtanh.f32 %v209_v63 }
 0x15f   :  { %514 = vtanh.f32 %v208_v0 }
 0x168   :  { %v513_v1 = vpop.eup %512 }
 0x169   :  { %v515_v2 = vpop.eup %514  ;;  %v213_v3 = vadd.f32 1.0, %v513_v1 }
 0x16a   :  { %v212_v5 = vadd.f32 1.0, %v515_v2 }
 0x16b   :  { %v215_v8 = vmul.f32 %v213_v3, %v199_v6 }
 0x16c   :  { %v214_v7 = vmul.f32 %v212_v5, %v198_v4 }
 0x16e   :  { %437 = vmatprep.mubr.f32.mxu1 %v214_v7 }
 0x16f   :  { %438 = vmatmul.mubr.f32.vlgmr.msra.gmra.mrb[0].mxu1 %v215_v8 }
 0x242   :  { %v439_v10 = vpop.f32.mrb[0].mxu1 }
 0x243   :  { %v310_v11 = vadd.f32 %v439_v10, %v332_v9  ;;  %v300_v12 = vpop.f32.mrb[1].mxu1 }
 0x244   :  { %v309_v13 = vadd.f32 %v332_v9, %v300_v12 }
 0x245   :  { %312 = vst [vmem:[#allocation11 + $0x8] sm:$0xff] %v310_v11 }
 0x246   :  { %311 = vst [vmem:[#allocation11] sm:$0xff] %v309_v13 }
 0x247   :  { %637 = shalt.err (!%p634_p2)
}
 0x248   :  { %s638_s9 = scalar_lea.hbm %s790_s5, 256 }
 0x249   :  { %p639_p3 = scmp.ne.s32.totalorder %s790_s5, %s638_s9  ;;  %p642_p4 = scmp.lt.u32.totalorder %s638_s9, %s790_s5 }
 0x24b   :  { %p644_p5 = pnand %p642_p4, %p639_p3 }
 0x24d   :  { %647 = shalt.err (!%p644_p5)
}
 0x24e   :  { %324 = dma.vmem_to_hbm [thread:$0]  %s319_s3, 256, %s790_s5, [#allocation4], %s658_s30, %s658_s30, %s659_s6  }
 0x24f   :  { %654 = dma.done.wait [#allocation4], 256  }
 0x250   :  { %655 = vsyncadd [#allocation4], 4294967040 }
 0x251   :  { %328 = vsyncpa [#allocation3], 1 }
 0x252   :  { %329 = vsyncpa [#allocation6], 1 }
 0x253   :  { %330 = vsyncpa [#allocation9], 1 }
 0x254   :  { %331 = vsyncpa [#allocation4], 1 }

</bundles_post_ra>
